<compile_context>
chip_gen: v5e
topology: v5e:2x2
jax: 0.10.0
libtpu: 0.0.40
codegen_flags: <defaults>
</compile_context>

<pallas_src>
import functools

import jax
import jax.numpy as jnp
from jax.experimental import pallas as pl
from jax.experimental.pallas import tpu as pltpu


# ---------------------------------------------------------------------------
# Kernel
# ---------------------------------------------------------------------------
def _rnn_seq_kernel(
    x_ref,               # (B, I)    f32   per-timestep block (time dim squeezed)
    h1_init_ref,         # (B, H)    f32   VMEM-resident (constant block index)
    h2_init_ref,         # (B, H)    f32   VMEM-resident
    w1_ref, b1_ref,      # (I+H,H+I) cdt,  (1, H+I) f32   VMEM-resident
    w2_ref, b2_ref,      # (I+H,H+O) cdt,  (1, H+O) f32   VMEM-resident
    out_ref,             # (B, O)    f32   per-timestep block
    h1_out_ref,          # (B, H)    f32   VMEM-resident; doubles as the carry
    h2_out_ref,          # (B, H)    f32   VMEM-resident; doubles as the carry
    *, hidden_size,
):
    H = hidden_size
    t = pl.program_id(0)
    cdt = w1_ref.dtype   # matmul compute dtype (f32 or bf16)

    # Initialize the carried hidden state (lives in the resident output blocks).
    @pl.when(t == 0)
    def _():
        h1_out_ref[...] = h1_init_ref[...]
        h2_out_ref[...] = h2_init_ref[...]

    # ---- stage 1: [h1_new | o1] = [x_t | h1] @ W1 + b1  (one MXU matmul) ----
    combined1 = jnp.concatenate(
        [x_ref[...].astype(cdt), h1_out_ref[...].astype(cdt)], axis=1)
    s1 = (
        jnp.dot(combined1, w1_ref[...], preferred_element_type=jnp.float32)
        + b1_ref[...]
    )
    h1_new = s1[:, :H]            # (B, H) f32
    o1 = s1[:, H:]                # (B, I) f32

    # ---- stage 2: [h2_new | o2] = [o1 | h2] @ W2 + b2 (one MXU matmul) ----
    combined2 = jnp.concatenate(
        [o1.astype(cdt), h2_out_ref[...].astype(cdt)], axis=1)
    s2 = (
        jnp.dot(combined2, w2_ref[...], preferred_element_type=jnp.float32)
        + b2_ref[...]
    )
    h2_new = s2[:, :H]            # (B, H) f32
    o2 = s2[:, H:]                # (B, O) f32

    # ---- LogSoftmax over features (dim=1), numerically stable, f32 ----
    m = jnp.max(o2, axis=1, keepdims=True)
    z = o2 - m
    lse = jnp.log(jnp.sum(jnp.exp(z), axis=1, keepdims=True))
    out_ref[...] = z - lse

    # Update the carried state (VMEM store; written back to HBM once at end).
    h1_out_ref[...] = h1_new
    h2_out_ref[...] = h2_new


# ---------------------------------------------------------------------------
# Wrappers
# ---------------------------------------------------------------------------
def language_model_rnn_forward_seq(xs, h1, h2, fused):
    """Run the RNN over a whole sequence in ONE Pallas kernel.

    xs: (T, B, I) f32; h1, h2: (B, H) f32. `fused` from fuse_params(); the
    matmul compute dtype is fused["w1"].dtype (f32 or bf16).
    Returns (log_softmax outputs (T, B, O), final hidden1 (B, H), final
    hidden2 (B, H)), all f32.
    """
    T, B, I = xs.shape
    H = h1.shape[1]
    N2 = fused["w2"].shape[1]
    O = N2 - H
    K = I + H
    N1 = fused["w1"].shape[1]

    kernel = functools.partial(_rnn_seq_kernel, hidden_size=H)

    const_idx2 = lambda t: (0, 0)

    grid_spec = pltpu.PrefetchScalarGridSpec(
        num_scalar_prefetch=0,
        grid=(T,),
        in_specs=[
            # x_t: streamed, pipelines with compute.
            pl.BlockSpec((None, B, I), lambda t: (t, 0, 0)),
            # Initial hidden states: tiny, constant block index.
            pl.BlockSpec((B, H), const_idx2),
            pl.BlockSpec((B, H), const_idx2),
            # Fused weights / biases: constant block index -> DMA'd once.
            pl.BlockSpec((K, N1), const_idx2),
            pl.BlockSpec((1, N1), const_idx2),
            pl.BlockSpec((K, N2), const_idx2),
            pl.BlockSpec((1, N2), const_idx2),
        ],
        out_specs=(
            # Per-timestep log-softmax output: streamed back per step.
            pl.BlockSpec((None, B, O), lambda t: (t, 0, 0)),
            # Final hidden states: constant block index (carried in VMEM,
            # written back to HBM once at the end of the grid).
            pl.BlockSpec((B, H), const_idx2),
            pl.BlockSpec((B, H), const_idx2),
        ),
    )

    flops_per_step = 2 * B * K * N1 + 2 * B * K * N2
    bytes_weights = sum(int(fused[k].size) * fused[k].dtype.itemsize
                        for k in ("w1", "b1", "w2", "b2"))
    cost = pl.CostEstimate(
        flops=int(T * flops_per_step),
        transcendentals=int(T * B * (O + 1)),
        bytes_accessed=int(bytes_weights
                           + xs.size * 4 + T * B * O * 4 + 4 * B * H * 4),
    )

    out, h1_new, h2_new = pl.pallas_call(
        kernel,
        grid_spec=grid_spec,
        out_shape=(
            jax.ShapeDtypeStruct((T, B, O), jnp.float32),
            jax.ShapeDtypeStruct((B, H), jnp.float32),
            jax.ShapeDtypeStruct((B, H), jnp.float32),
        ),
        compiler_params=pltpu.CompilerParams(
            dimension_semantics=("arbitrary",),   # sequential carry over time
        ),
        cost_estimate=cost,
    )(xs, h1, h2, fused["w1"], fused["b1"], fused["w2"], fused["b2"])
    return out, h1_new, h2_new


def language_model_rnn_forward(x, h1, h2, fused):
    """Single forward step (exact semantics of the PyTorch module.forward)."""
    out, h1_new, h2_new = language_model_rnn_forward_seq(x[None], h1, h2, fused)
    return out[0], h1_new, h2_new


# ---------------------------------------------------------------------------
# Parameter construction / fusion (host side, done once)
# ---------------------------------------------------------------------------
def make_params(key, input_size, hidden_size, output_size):
    """Deterministic synthetic parameters (uniform init like nn.Linear)."""
    def linear(key, fan_in, fan_out):
        kw, kb = jax.random.split(key)
        bound = 1.0 / jnp.sqrt(fan_in)
        w = jax.random.uniform(kw, (fan_in, fan_out), jnp.float32, -bound, bound)
        b = jax.random.uniform(kb, (1, fan_out), jnp.float32, -bound, bound)
        return w, b

    k1, k2, k3, k4 = jax.random.split(key, 4)
    cat = input_size + hidden_size
    w_ih1, b_ih1 = linear(k1, cat, hidden_size)   # i_2_h1
    w_io1, b_io1 = linear(k2, cat, input_size)    # i_2_o1
    w_oh2, b_oh2 = linear(k3, cat, hidden_size)   # o1_2_h2
    w_oo2, b_oo2 = linear(k4, cat, output_size)   # o1_2_o2
    return dict(
        w_ih1=w_ih1, b_ih1=b_ih1, w_io1=w_io1, b_io1=b_io1,
        w_oh2=w_oh2, b_oh2=b_oh2, w_oo2=w_oo2, b_oo2=b_oo2,
    )


def fuse_params(p, compute_dtype=jnp.bfloat16):
    """Fuse the four Linears into two matrices (host-side, done once).

    Linear(cat(a, b)) == a @ W_a + b @ W_b + bias, and two Linears sharing the
    same input fuse along the output axis, so each stage is ONE matmul.
    Weights are cast to compute_dtype; bf16 is fine on v5e/v6e/v7x (MXU takes
    bf16 natively, f32 accumulation). Biases stay f32 (added post-accumulation).
    """
    w1 = jnp.concatenate([p["w_ih1"], p["w_io1"]], axis=1).astype(compute_dtype)
    b1 = jnp.concatenate([p["b_ih1"], p["b_io1"]], axis=1).astype(jnp.float32)
    w2 = jnp.concatenate([p["w_oh2"], p["w_oo2"]], axis=1).astype(compute_dtype)
    b2 = jnp.concatenate([p["b_oh2"], p["b_oo2"]], axis=1).astype(jnp.float32)
    return dict(w1=w1, b1=b1, w2=w2, b2=b2)


# ---------------------------------------------------------------------------
# Pure-JAX references
# ---------------------------------------------------------------------------
def reference_forward(x, h1, h2, p):
    """f32 reference matching the PyTorch module semantics (one step)."""
    c1 = jnp.concatenate([x, h1], axis=1)
    h1n = c1 @ p["w_ih1"] + p["b_ih1"]
    o1 = c1 @ p["w_io1"] + p["b_io1"]
    c2 = jnp.concatenate([o1, h2], axis=1)
    h2n = c2 @ p["w_oh2"] + p["b_oh2"]
    o2 = c2 @ p["w_oo2"] + p["b_oo2"]
    return jax.nn.log_softmax(o2, axis=1), h1n, h2n


def reference_forward_seq(xs, h1, h2, p):
    outs = []
    for t in range(xs.shape[0]):
        o, h1, h2 = reference_forward(xs[t], h1, h2, p)
        outs.append(o)
    return jnp.stack(outs, axis=0), h1, h2


# ---------------------------------------------------------------------------
if __name__ == "__main__":
    # Small, lane-aligned demo shapes (feature dims multiples of 128; the
    # hidden size matches the module's default of 256).
    input_size, hidden_size, output_size = 128, 256, 128
    batch, seq_len = 8, 8

    key = jax.random.PRNGKey(0)
    kx, kh1, kh2, kp = jax.random.split(key, 4)
    xs = jax.random.normal(kx, (seq_len, batch, input_size), jnp.float32)
    h1 = jax.random.normal(kh1, (batch, hidden_size), jnp.float32)
    h2 = jax.random.normal(kh2, (batch, hidden_size), jnp.float32)
    params = make_params(kp, input_size, hidden_size, output_size)

    ref_out1, ref_h1_1, ref_h2_1 = reference_forward(xs[0], h1, h2, params)
    ref_outs, ref_h1_T, ref_h2_T = reference_forward_seq(xs, h1, h2, params)

    # ---- f32 weight path: exact semantics of the PyTorch module ----
    fused_f32 = fuse_params(params, jnp.float32)

    # Single step (module.forward).
    out1, h1_1, h2_1 = language_model_rnn_forward(xs[0], h1, h2, fused_f32)
    jax.block_until_ready((out1, h1_1, h2_1))
    assert jnp.allclose(out1, ref_out1, atol=1e-3, rtol=1e-4), "f32 step output mismatch"
    assert jnp.allclose(h1_1, ref_h1_1, atol=1e-3, rtol=1e-4), "f32 step hidden1 mismatch"
    assert jnp.allclose(h2_1, ref_h2_1, atol=1e-3, rtol=1e-4), "f32 step hidden2 mismatch"

    # Full sequence in one kernel (grid=(T,), weights DMA'd once).
    outs, h1_T, h2_T = language_model_rnn_forward_seq(xs, h1, h2, fused_f32)
    jax.block_until_ready((outs, h1_T, h2_T))
    assert jnp.allclose(outs, ref_outs, atol=2e-3, rtol=1e-3), "f32 seq output mismatch"
    assert jnp.allclose(h1_T, ref_h1_T, atol=2e-3, rtol=1e-3), "f32 seq hidden1 mismatch"
    assert jnp.allclose(h2_T, ref_h2_T, atol=2e-3, rtol=1e-3), "f32 seq hidden2 mismatch"

    # ---- bf16 weight path (recommended default on v5e/v6e/v7x) ----
    fused_bf16 = fuse_params(params, jnp.bfloat16)
    outs_b, h1_b, h2_b = language_model_rnn_forward_seq(xs, h1, h2, fused_bf16)
    jax.block_until_ready((outs_b, h1_b, h2_b))
    assert jnp.allclose(outs_b, ref_outs, atol=1.5e-1, rtol=1e-1), "bf16 seq output mismatch"
    assert jnp.allclose(h1_b, ref_h1_T, atol=1.5e-1, rtol=1e-1), "bf16 seq hidden1 mismatch"
    assert jnp.allclose(h2_b, ref_h2_T, atol=1.5e-1, rtol=1e-1), "bf16 seq hidden2 mismatch"

    print("KERNEL_OK")
</pallas_src>

<mosaic_0001>
module attributes {stable_mosaic.version = 11 : i64} {
  func.func @_rnn_seq_kernel(%arg0: i32, %arg1: memref<1x8x128xf32, #tpu.memory_space<vmem>>, %arg2: memref<8x256xf32, #tpu.memory_space<vmem>>, %arg3: memref<8x256xf32, #tpu.memory_space<vmem>>, %arg4: memref<384x384xf32, #tpu.memory_space<vmem>>, %arg5: memref<1x384xf32, #tpu.memory_space<vmem>>, %arg6: memref<384x384xf32, #tpu.memory_space<vmem>>, %arg7: memref<1x384xf32, #tpu.memory_space<vmem>>, %arg8: memref<1x8x128xf32, #tpu.memory_space<vmem>>, %arg9: memref<8x256xf32, #tpu.memory_space<vmem>>, %arg10: memref<8x256xf32, #tpu.memory_space<vmem>>) attributes {dimension_semantics = [#tpu.dimension_semantics<arbitrary>], iteration_bounds = array<i64: 1>, scalar_prefetch = 0 : i64, scratch_operands = 0 : i64, tpu.core_type = #tpu.core_type<tc>, window_params = [{transform_indices = @transform_0, window_bounds = array<i64: 1, 8, 128>}, {pipeline_mode = #tpu.pipeline_mode<synchronous>, transform_indices = @transform_1, window_bounds = array<i64: 8, 256>}, {pipeline_mode = #tpu.pipeline_mode<synchronous>, transform_indices = @transform_2, window_bounds = array<i64: 8, 256>}, {pipeline_mode = #tpu.pipeline_mode<synchronous>, transform_indices = @transform_3, window_bounds = array<i64: 384, 384>}, {pipeline_mode = #tpu.pipeline_mode<synchronous>, transform_indices = @transform_4, window_bounds = array<i64: 1, 384>}, {pipeline_mode = #tpu.pipeline_mode<synchronous>, transform_indices = @transform_5, window_bounds = array<i64: 384, 384>}, {pipeline_mode = #tpu.pipeline_mode<synchronous>, transform_indices = @transform_6, window_bounds = array<i64: 1, 384>}, {transform_indices = @transform_7, window_bounds = array<i64: 1, 8, 128>}, {pipeline_mode = #tpu.pipeline_mode<synchronous>, transform_indices = @transform_8, window_bounds = array<i64: 8, 256>}, {pipeline_mode = #tpu.pipeline_mode<synchronous>, transform_indices = @transform_9, window_bounds = array<i64: 8, 256>}]} {
    %c0_i32 = arith.constant 0 : i32
    %0 = arith.cmpi eq, %arg0, %c0_i32 : i32
    %1 = arith.extui %0 : i1 to i32
    %c0_i32_0 = arith.constant 0 : i32
    %2 = arith.cmpi ne, %1, %c0_i32_0 : i32
    scf.if %2 {
      %c0_25 = arith.constant 0 : index
      %c0_26 = arith.constant 0 : index
      %38 = vector.load %arg2[%c0_25, %c0_26] : memref<8x256xf32, #tpu.memory_space<vmem>>, vector<8x256xf32>
      %c0_27 = arith.constant 0 : index
      %c0_28 = arith.constant 0 : index
      %39 = vector.load %arg9[%c0_27, %c0_28] : memref<8x256xf32, #tpu.memory_space<vmem>>, vector<8x256xf32>
      tpu.vector_store %arg9[%c0_27, %c0_28], %38 {strides = array<i32>} : memref<8x256xf32, #tpu.memory_space<vmem>>, vector<8x256xf32>,
      %c0_29 = arith.constant 0 : index
      %c0_30 = arith.constant 0 : index
      %40 = vector.load %arg3[%c0_29, %c0_30] : memref<8x256xf32, #tpu.memory_space<vmem>>, vector<8x256xf32>
      %c0_31 = arith.constant 0 : index
      %c0_32 = arith.constant 0 : index
      %41 = vector.load %arg10[%c0_31, %c0_32] : memref<8x256xf32, #tpu.memory_space<vmem>>, vector<8x256xf32>
      tpu.vector_store %arg10[%c0_31, %c0_32], %40 {strides = array<i32>} : memref<8x256xf32, #tpu.memory_space<vmem>>, vector<8x256xf32>,
    } else {
    }
    %c0 = arith.constant 0 : index
    %c0_1 = arith.constant 0 : index
    %c0_2 = arith.constant 0 : index
    %3 = vector.load %arg1[%c0, %c0_1, %c0_2] : memref<1x8x128xf32, #tpu.memory_space<vmem>>, vector<1x8x128xf32>
    %4 = vector.shape_cast %3 : vector<1x8x128xf32> to vector<8x128xf32>
    %c0_3 = arith.constant 0 : index
    %c0_4 = arith.constant 0 : index
    %5 = vector.load %arg9[%c0_3, %c0_4] : memref<8x256xf32, #tpu.memory_space<vmem>>, vector<8x256xf32>
    %6 = tpu.concatenate %4, %5 in 1 : vector<8x128xf32>, vector<8x256xf32> -> vector<8x384xf32>
    %c0_5 = arith.constant 0 : index
    %c0_6 = arith.constant 0 : index
    %7 = vector.load %arg4[%c0_5, %c0_6] : memref<384x384xf32, #tpu.memory_space<vmem>>, vector<384x384xf32>
    %cst = arith.constant dense<0.000000e+00> : vector<8x384xf32>
    %8 = tpu.matmul %6, %7, %cst {dimension_numbers = #tpu.dot_dimension_numbers<[1], [0], [0], [1], [0, 0, 1, 1], [], []>} : vector<8x384xf32>, vector<384x384xf32>, vector<8x384xf32> -> vector<8x384xf32>
    %c0_7 = arith.constant 0 : index
    %c0_8 = arith.constant 0 : index
    %9 = vector.load %arg5[%c0_7, %c0_8] : memref<1x384xf32, #tpu.memory_space<vmem>>, vector<1x384xf32>
    %10 = vector.broadcast %9 : vector<1x384xf32> to vector<8x384xf32>
    %11 = arith.addf %8, %10 : vector<8x384xf32>
    %12 = vector.extract_strided_slice %11 {offsets = [0, 0], sizes = [8, 256], strides = [1, 1]} : vector<8x384xf32> to vector<8x256xf32>
    %13 = vector.extract_strided_slice %11 {offsets = [0, 256], sizes = [8, 128], strides = [1, 1]} : vector<8x384xf32> to vector<8x128xf32>
    %c0_9 = arith.constant 0 : index
    %c0_10 = arith.constant 0 : index
    %14 = vector.load %arg10[%c0_9, %c0_10] : memref<8x256xf32, #tpu.memory_space<vmem>>, vector<8x256xf32>
    %15 = tpu.concatenate %13, %14 in 1 : vector<8x128xf32>, vector<8x256xf32> -> vector<8x384xf32>
    %c0_11 = arith.constant 0 : index
    %c0_12 = arith.constant 0 : index
    %16 = vector.load %arg6[%c0_11, %c0_12] : memref<384x384xf32, #tpu.memory_space<vmem>>, vector<384x384xf32>
    %cst_13 = arith.constant dense<0.000000e+00> : vector<8x384xf32>
    %17 = tpu.matmul %15, %16, %cst_13 {dimension_numbers = #tpu.dot_dimension_numbers<[1], [0], [0], [1], [0, 0, 1, 1], [], []>} : vector<8x384xf32>, vector<384x384xf32>, vector<8x384xf32> -> vector<8x384xf32>
    %c0_14 = arith.constant 0 : index
    %c0_15 = arith.constant 0 : index
    %18 = vector.load %arg7[%c0_14, %c0_15] : memref<1x384xf32, #tpu.memory_space<vmem>>, vector<1x384xf32>
    %19 = vector.broadcast %18 : vector<1x384xf32> to vector<8x384xf32>
    %20 = arith.addf %17, %19 : vector<8x384xf32>
    %21 = vector.extract_strided_slice %20 {offsets = [0, 0], sizes = [8, 256], strides = [1, 1]} : vector<8x384xf32> to vector<8x256xf32>
    %22 = vector.extract_strided_slice %20 {offsets = [0, 256], sizes = [8, 128], strides = [1, 1]} : vector<8x384xf32> to vector<8x128xf32>
    %cst_16 = arith.constant dense<0xFF800000> : vector<8xf32>
    %23 = vector.multi_reduction <maximumf>, %22, %cst_16 [1] : vector<8x128xf32> to vector<8xf32>
    %24 = vector.shape_cast %23 : vector<8xf32> to vector<8x1xf32>
    %25 = vector.broadcast %24 : vector<8x1xf32> to vector<8x128xf32>
    %26 = arith.subf %22, %25 : vector<8x128xf32>
    %27 = math.exp %26 : vector<8x128xf32>
    %cst_17 = arith.constant dense<0.000000e+00> : vector<8xf32>
    %28 = vector.multi_reduction <add>, %27, %cst_17 [1] : vector<8x128xf32> to vector<8xf32>
    %29 = vector.shape_cast %28 : vector<8xf32> to vector<8x1xf32>
    %30 = math.log %29 : vector<8x1xf32>
    %31 = vector.broadcast %30 : vector<8x1xf32> to vector<8x128xf32>
    %32 = arith.subf %26, %31 : vector<8x128xf32>
    %c0_18 = arith.constant 0 : index
    %c0_19 = arith.constant 0 : index
    %c0_20 = arith.constant 0 : index
    %33 = vector.load %arg8[%c0_18, %c0_19, %c0_20] : memref<1x8x128xf32, #tpu.memory_space<vmem>>, vector<1x8x128xf32>
    %34 = vector.shape_cast %33 : vector<1x8x128xf32> to vector<8x128xf32>
    %35 = vector.shape_cast %32 : vector<8x128xf32> to vector<1x8x128xf32>
    tpu.vector_store %arg8[%c0_18, %c0_19, %c0_20], %35 {strides = array<i32>} : memref<1x8x128xf32, #tpu.memory_space<vmem>>, vector<1x8x128xf32>,
    %c0_21 = arith.constant 0 : index
    %c0_22 = arith.constant 0 : index
    %36 = vector.load %arg9[%c0_21, %c0_22] : memref<8x256xf32, #tpu.memory_space<vmem>>, vector<8x256xf32>
    tpu.vector_store %arg9[%c0_21, %c0_22], %12 {strides = array<i32>} : memref<8x256xf32, #tpu.memory_space<vmem>>, vector<8x256xf32>,
    %c0_23 = arith.constant 0 : index
    %c0_24 = arith.constant 0 : index
    %37 = vector.load %arg10[%c0_23, %c0_24] : memref<8x256xf32, #tpu.memory_space<vmem>>, vector<8x256xf32>
    tpu.vector_store %arg10[%c0_23, %c0_24], %21 {strides = array<i32>} : memref<8x256xf32, #tpu.memory_space<vmem>>, vector<8x256xf32>,
    return
  }
  func.func @transform_0(%arg0: i32) -> (i32, i32, i32) {
    %c0_i32 = arith.constant 0 : i32
    %c0_i32_0 = arith.constant 0 : i32
    %c0_i32_1 = arith.constant 0 : i32
    return %arg0, %c0_i32, %c0_i32_0 : i32, i32, i32
  }
  func.func @transform_1(%arg0: i32) -> (i32, i32) {
    %c0_i32 = arith.constant 0 : i32
    %c0_i32_0 = arith.constant 0 : i32
    %c0_i32_1 = arith.constant 0 : i32
    return %c0_i32, %c0_i32_0 : i32, i32
  }
  func.func @transform_2(%arg0: i32) -> (i32, i32) {
    %c0_i32 = arith.constant 0 : i32
    %c0_i32_0 = arith.constant 0 : i32
    %c0_i32_1 = arith.constant 0 : i32
    return %c0_i32, %c0_i32_0 : i32, i32
  }
  func.func @transform_3(%arg0: i32) -> (i32, i32) {
    %c0_i32 = arith.constant 0 : i32
    %c0_i32_0 = arith.constant 0 : i32
    %c0_i32_1 = arith.constant 0 : i32
    return %c0_i32, %c0_i32_0 : i32, i32
  }
  func.func @transform_4(%arg0: i32) -> (i32, i32) {
    %c0_i32 = arith.constant 0 : i32
    %c0_i32_0 = arith.constant 0 : i32
    %c0_i32_1 = arith.constant 0 : i32
    return %c0_i32, %c0_i32_0 : i32, i32
  }
  func.func @transform_5(%arg0: i32) -> (i32, i32) {
    %c0_i32 = arith.constant 0 : i32
    %c0_i32_0 = arith.constant 0 : i32
    %c0_i32_1 = arith.constant 0 : i32
    return %c0_i32, %c0_i32_0 : i32, i32
  }
  func.func @transform_6(%arg0: i32) -> (i32, i32) {
    %c0_i32 = arith.constant 0 : i32
    %c0_i32_0 = arith.constant 0 : i32
    %c0_i32_1 = arith.constant 0 : i32
    return %c0_i32, %c0_i32_0 : i32, i32
  }
  func.func @transform_7(%arg0: i32) -> (i32, i32, i32) {
    %c0_i32 = arith.constant 0 : i32
    %c0_i32_0 = arith.constant 0 : i32
    %c0_i32_1 = arith.constant 0 : i32
    return %arg0, %c0_i32, %c0_i32_0 : i32, i32, i32
  }
  func.func @transform_8(%arg0: i32) -> (i32, i32) {
    %c0_i32 = arith.constant 0 : i32
    %c0_i32_0 = arith.constant 0 : i32
    %c0_i32_1 = arith.constant 0 : i32
    return %c0_i32, %c0_i32_0 : i32, i32
  }
  func.func @transform_9(%arg0: i32) -> (i32, i32) {
    %c0_i32 = arith.constant 0 : i32
    %c0_i32_0 = arith.constant 0 : i32
    %c0_i32_1 = arith.constant 0 : i32
    return %c0_i32, %c0_i32_0 : i32, i32
  }
}

</mosaic_0001>

<bundles_post_ra>
// kernel: tpu_custom_call.1
= control target key start
LH: loop header
LB: loop body
LE: loop exit
PB: predicated region body
PF: predicated region fallthrough
CT: control target
= control target key end

     0   :  { %15 = vsyncpa [#allocation3], 0  ;;  %s1228_s0 = inlined_call_operand.hbm [shape: f32[1,8,128], index: 0, kind: input, shape index: {}]   ;;  %s1229_s1 = inlined_call_operand.hbm [shape: f32[8,256], index: 1, kind: input, shape index: {}]   ;;  %s1230_s2 = inlined_call_operand.hbm [shape: f32[8,256], index: 2, kind: input, shape index: {}]   ;;  %s1231_s3 = inlined_call_operand.hbm [shape: f32[384,384], index: 3, kind: input, shape index: {}]   ;;  %s1232_s4 = inlined_call_operand.vmem [shape: f32[1,384], index: 4, kind: input, shape index: {}]   ;;  %s1233_s5 = inlined_call_operand.hbm [shape: f32[384,384], index: 5, kind: input, shape index: {}]   ;;  %s1234_s6 = inlined_call_operand.hbm [shape: f32[1,384], index: 6, kind: input, shape index: {}]   ;;  %s1235_s7 = inlined_call_operand.hbm [shape: f32[1,8,128], index: 7, kind: output, shape index: {0}]   ;;  %s1236_s8 = inlined_call_operand.hbm [shape: f32[8,256], index: 8, kind: output, shape index: {1}]   ;;  %s1237_s9 = inlined_call_operand.hbm [shape: f32[8,256], index: 9, kind: output, shape index: {2}]  }
   0x1   :  { %16 = vsyncpa [#allocation6], 0 }
   0x2   :  { %17 = vsyncpa [#allocation9], 0 }
   0x3   :  { %18 = vsyncpa [#allocation12], 0 }
   0x4   :  { %19 = vsyncpa [#allocation4], 0  ;;  %s37_s11 = sshll.u32 %s1229_s1, 4  ;;  %s38_s11 = int_to_ptr.hbm [resolvable:$true] %s37_s11 }
   0x5   :  { %20 = vsyncpa [#allocation15], 0  ;;  %s1107_s12 = smov [#allocation5]   ;;  %s58_s16 = sshll.u32 %s1231_s3, 4  ;;  %s59_s16 = int_to_ptr.hbm [resolvable:$true] %s58_s16 }
   0x6   :  { %s39_s13 = sshll.u32 %s1107_s12, 4  ;;  %s1108_s17 = smov [#allocation8]   ;;  %s40_s13 = int_to_ptr.vmem [resolvable:$true] %s39_s13 }
   0x7   :  { %42 = dma.hbm_to_vmem [thread:$0]  %s38_s11, 256, %s40_s13, [#allocation6]  }
   0x8   :  { %s60_s18 = sshll.u32 %s1108_s17, 4  ;;  %s1109_s19 = smov 384   ;;  %s61_s18 = int_to_ptr.vmem [resolvable:$true] %s60_s18 }
   0x9   :  { %s1110_s20 = smov 24   ;;  %s26_s1 = sshll.u32 %s1228_s0, 4  ;;  %s27_s1 = int_to_ptr.hbm [resolvable:$true] %s26_s1 }
   0xa   :  { %66 = dma.hbm_to_vmem [thread:$0]  %s59_s16, 18432, %s61_s18, [#allocation9], %s1109_s19, %s1109_s19, %s1110_s20  }
   0xb   :  { %s1111_s23 = smov [#allocation2]   ;;  %s48_s3 = sshll.u32 %s1230_s2, 4  ;;  %s49_s3 = int_to_ptr.hbm [resolvable:$true] %s48_s3 }
   0xc   :  { %s28_s24 = sshll.u32 %s1111_s23, 4  ;;  %s1112_s27 = smov [#allocation7]   ;;  %s29_s24 = int_to_ptr.vmem [resolvable:$true] %s28_s24 }
   0xd   :  { %31 = dma.hbm_to_vmem [thread:$0]  %s27_s1, 128, %s29_s24, [#allocation3]  }
   0xe   :  { %s50_s28 = sshll.u32 %s1112_s27, 4  ;;  %s73_s10 = sshll.u32 %s1233_s5, 4  ;;  %s51_s28 = int_to_ptr.vmem [resolvable:$true] %s50_s28  ;;  %s74_s10 = int_to_ptr.hbm [resolvable:$true] %s73_s10 }
   0xf   :  { %53 = dma.hbm_to_vmem [thread:$0]  %s49_s3, 256, %s51_s28, [#allocation6]  }
  0x10   :  { %s87_s12 = sshll.u32 %s1234_s6, 4  ;;  %s1113_s13 = smov [#allocation10]   ;;  %s88_s12 = int_to_ptr.hbm [resolvable:$true] %s87_s12 }
  0x11   :  { %s75_s14 = sshll.u32 %s1113_s13, 4  ;;  %s1114_s2 = smov [#allocation11]   ;;  %s76_s14 = int_to_ptr.vmem [resolvable:$true] %s75_s14 }
  0x12   :  { %81 = dma.hbm_to_vmem [thread:$0]  %s74_s10, 18432, %s76_s14, [#allocation9], %s1109_s19, %s1109_s19, %s1110_s20  }
  0x13   :  { %s89_s15 = sshll.u32 %s1114_s2, 4  ;;  %s90_s15 = int_to_ptr.vmem [resolvable:$true] %s89_s15 }
  0x14   :  { %92 = dma.hbm_to_vmem [thread:$0]  %s88_s12, 48, %s90_s15, [#allocation12]  }
  0x15   :  { %1095 = dma.done.wait [#allocation3], 128  }
  0x16   :  { %1096 = vsyncadd [#allocation3], 4294967168 }
  0x17   :  { %1097 = dma.done.wait [#allocation6], 512  }
  0x18   :  { %1098 = vsyncadd [#allocation6], 4294966784 }
  0x19   :  { %1099 = dma.done.wait [#allocation9], 36864  }
  0x1a   :  { %1100 = vsyncadd [#allocation9], 4294930432 }
  0x1b   :  { %1101 = dma.done.wait [#allocation12], 48  }
  0x1c   :  { %1102 = vsyncadd [#allocation12], 4294967248  ;;  %v177_v0 = vld [vmem:[#allocation8 + $0x168] sm:$0xff]  ;;  %v174_v1 = vld [vmem:[#allocation8 + $0x150] sm:$0xff]  ;;  %s831_s19 = sshll.u32 %s1236_s8, 4  ;;  %s1116_s20 = smov [#allocation16]   ;;  %s832_s19 = int_to_ptr.hbm [resolvable:$true] %s831_s19 }
  0x1d   :  { %284 = vmatpush.msra.mxu0 %v177_v0  ;;  %v171_v2 = vld [vmem:[#allocation8 + $0x138] sm:$0xff]  ;;  %v273_v3 = vld [vmem:[#allocation8 + $0x468] sm:$0xff]  ;;  %v168_v4 = vld [vmem:[#allocation8 + $0x120] sm:$0xff]  ;;  %s840_s21 = sshll.u32 %s1116_s20, 4  ;;  %s842_s23 = sshll.u32 %s1237_s9, 4  ;;  %s841_s21 = int_to_ptr.vmem [resolvable:$true] %s840_s21  ;;  %s843_s23 = int_to_ptr.hbm [resolvable:$true] %s842_s23 }
  0x1e   :  { %324 = vmatpush.msra.mxu2 %v273_v3  ;;  %v270_v5 = vld [vmem:[#allocation8 + $0x450] sm:$0xff]  ;;  %v225_v7 = vld [vmem:[#allocation8 + $0x2e8] sm:$0xff]  ;;  %v267_v8 = vld [vmem:[#allocation8 + $0x438] sm:$0xff]  ;;  %s1117_s24 = smov [#allocation13]   ;;  %s820_s3 = sshll.u32 %s1235_s7, 4  ;;  %s821_s3 = int_to_ptr.hbm [resolvable:$true] %s820_s3 }
  0x1f   :  { %285 = vmatpush.msra.mxu0 %v174_v1  ;;  %v178_v6 = vld [vmem:[#allocation8 + $0x170] sm:$0xff]  ;;  %v165_v9 = vld [vmem:[#allocation8 + $0x108] sm:$0xff]  ;;  %304 = vmatpush.msra.mxu1 %v225_v7  ;;  %v175_v10 = vld [vmem:[#allocation8 + $0x158] sm:$0xff]  ;;  %s818_s25 = sshll.u32 %s1117_s24, 4  ;;  %s819_s25 = int_to_ptr.vmem [resolvable:$true] %s818_s25 }
  0x20   :  { %344 = vmatpush.msra.mxu3 %v178_v6  ;;  %325 = vmatpush.msra.mxu2 %v270_v5  ;;  %v222_v11 = vld [vmem:[#allocation8 + $0x2d0] sm:$0xff]  ;;  %v264_v12 = vld [vmem:[#allocation8 + $0x420] sm:$0xff]  ;;  %v219_v15 = vld [vmem:[#allocation8 + $0x2b8] sm:$0xff] }
  0x21   :  { %286 = vmatpush.msra.mxu0 %v171_v2  ;;  %v172_v13 = vld [vmem:[#allocation8 + $0x140] sm:$0xff]  ;;  %v162_v14 = vld [vmem:[#allocation8 + $0xf0] sm:$0xff]  ;;  %305 = vmatpush.msra.mxu1 %v222_v11  ;;  %v169_v16 = vld [vmem:[#allocation8 + $0x128] sm:$0xff] }
  0x22   :  { %345 = vmatpush.msra.mxu3 %v175_v10  ;;  %326 = vmatpush.msra.mxu2 %v267_v8  ;;  %v261_v17 = vld [vmem:[#allocation8 + $0x408] sm:$0xff]  ;;  %v216_v18 = vld [vmem:[#allocation8 + $0x2a0] sm:$0xff]  ;;  %v159_v19 = vld [vmem:[#allocation8 + $0xd8] sm:$0xff] }
  0x23   :  { %287 = vmatpush.msra.mxu0 %v168_v4  ;;  %306 = vmatpush.msra.mxu1 %v219_v15  ;;  %v166_v20 = vld [vmem:[#allocation8 + $0x110] sm:$0xff]  ;;  %v213_v22 = vld [vmem:[#allocation8 + $0x288] sm:$0xff]  ;;  %v156_v23 = vld [vmem:[#allocation8 + $0xc0] sm:$0xff] }
  0x24   :  { %346 = vmatpush.msra.mxu3 %v172_v13  ;;  %327 = vmatpush.msra.mxu2 %v264_v12  ;;  %v258_v21 = vld [vmem:[#allocation8 + $0x3f0] sm:$0xff]  ;;  %v163_v24 = vld [vmem:[#allocation8 + $0xf8] sm:$0xff]  ;;  %v153_v27 = vld [vmem:[#allocation8 + $0xa8] sm:$0xff] }
  0x25   :  { %288 = vmatpush.msra.mxu0 %v165_v9  ;;  %307 = vmatpush.msra.mxu1 %v216_v18  ;;  %v255_v25 = vld [vmem:[#allocation8 + $0x3d8] sm:$0xff]  ;;  %v210_v26 = vld [vmem:[#allocation8 + $0x270] sm:$0xff]  ;;  %v160_v28 = vld [vmem:[#allocation8 + $0xe0] sm:$0xff] }
  0x26   :  { %347 = vmatpush.msra.mxu3 %v169_v16  ;;  %328 = vmatpush.msra.mxu2 %v261_v17  ;;  %v252_v29 = vld [vmem:[#allocation8 + $0x3c0] sm:$0xff]  ;;  %v207_v30 = vld [vmem:[#allocation8 + $0x258] sm:$0xff]  ;;  %v150_v31 = vld [vmem:[#allocation8 + $0x90] sm:$0xff] }
  0x27   :  { %289 = vmatpush.msra.mxu0 %v162_v14  ;;  %308 = vmatpush.msra.mxu1 %v213_v22  ;;  %v157_v32 = vld [vmem:[#allocation8 + $0xc8] sm:$0xff]  ;;  %v204_v34 = vld [vmem:[#allocation8 + $0x240] sm:$0xff]  ;;  %v147_v35 = vld [vmem:[#allocation8 + $0x78] sm:$0xff] }
  0x28   :  { %348 = vmatpush.msra.mxu3 %v166_v20  ;;  %329 = vmatpush.msra.mxu2 %v258_v21  ;;  %v249_v33 = vld [vmem:[#allocation8 + $0x3a8] sm:$0xff]  ;;  %v154_v36 = vld [vmem:[#allocation8 + $0xb0] sm:$0xff]  ;;  %v144_v39 = vld [vmem:[#allocation8 + $0x60] sm:$0xff] }
  0x29   :  { %290 = vmatpush.msra.mxu0 %v159_v19  ;;  %309 = vmatpush.msra.mxu1 %v210_v26  ;;  %v246_v37 = vld [vmem:[#allocation8 + $0x390] sm:$0xff]  ;;  %v201_v38 = vld [vmem:[#allocation8 + $0x228] sm:$0xff]  ;;  %v151_v40 = vld [vmem:[#allocation8 + $0x98] sm:$0xff] }
  0x2a   :  { %349 = vmatpush.msra.mxu3 %v163_v24  ;;  %330 = vmatpush.msra.mxu2 %v255_v25  ;;  %v243_v41 = vld [vmem:[#allocation8 + $0x378] sm:$0xff]  ;;  %v198_v42 = vld [vmem:[#allocation8 + $0x210] sm:$0xff]  ;;  %v141_v43 = vld [vmem:[#allocation8 + $0x48] sm:$0xff] }
  0x2b   :  { %291 = vmatpush.msra.mxu0 %v156_v23  ;;  %310 = vmatpush.msra.mxu1 %v207_v30  ;;  %v148_v44 = vld [vmem:[#allocation8 + $0x80] sm:$0xff]  ;;  %v195_v46 = vld [vmem:[#allocation8 + $0x1f8] sm:$0xff]  ;;  %v138_v47 = vld [vmem:[#allocation8 + $0x30] sm:$0xff] }
  0x2c   :  { %350 = vmatpush.msra.mxu3 %v160_v28  ;;  %331 = vmatpush.msra.mxu2 %v252_v29  ;;  %v240_v45 = vld [vmem:[#allocation8 + $0x360] sm:$0xff]  ;;  %v145_v48 = vld [vmem:[#allocation8 + $0x68] sm:$0xff]  ;;  %v135_v51 = vld [vmem:[#allocation8 + $0x18] sm:$0xff] }
  0x2d   :  { %292 = vmatpush.msra.mxu0 %v153_v27  ;;  %311 = vmatpush.msra.mxu1 %v204_v34  ;;  %v237_v49 = vld [vmem:[#allocation8 + $0x348] sm:$0xff]  ;;  %v192_v50 = vld [vmem:[#allocation8 + $0x1e0] sm:$0xff]  ;;  %v142_v52 = vld [vmem:[#allocation8 + $0x50] sm:$0xff] }
  0x2e   :  { %351 = vmatpush.msra.mxu3 %v157_v32  ;;  %332 = vmatpush.msra.mxu2 %v249_v33  ;;  %v234_v53 = vld [vmem:[#allocation8 + $0x330] sm:$0xff]  ;;  %v189_v54 = vld [vmem:[#allocation8 + $0x1c8] sm:$0xff]  ;;  %v132_v55 = vld [vmem:[#allocation8] sm:$0xff] }
  0x2f   :  { %293 = vmatpush.msra.mxu0 %v150_v31  ;;  %312 = vmatpush.msra.mxu1 %v201_v38  ;;  %v139_v56 = vld [vmem:[#allocation8 + $0x38] sm:$0xff]  ;;  %v226_v57 = vld [vmem:[#allocation8 + $0x2f0] sm:$0xff]  ;;  %v136_v60 = vld [vmem:[#allocation8 + $0x20] sm:$0xff] }
  0x30   :  { %352 = vmatpush.msra.mxu3 %v154_v36  ;;  %333 = vmatpush.msra.mxu2 %v246_v37  ;;  %v231_v58 = vld [vmem:[#allocation8 + $0x318] sm:$0xff]  ;;  %v186_v59 = vld [vmem:[#allocation8 + $0x1b0] sm:$0xff]  ;;  %v228_v62 = vld [vmem:[#allocation8 + $0x300] sm:$0xff] }
  0x31   :  { %294 = vmatpush.msra.mxu0 %v147_v35  ;;  %313 = vmatpush.msra.mxu1 %v198_v42  ;;  %v223_v61 = vld [vmem:[#allocation8 + $0x2d8] sm:$0xff]  ;;  %v220_v1 = vld [vmem:[#allocation8 + $0x2c0] sm:$0xff]  ;;  %v133_v2 = vld [vmem:[#allocation8 + $0x8] sm:$0xff] }
  0x32   :  { %353 = vmatpush.msra.mxu3 %v151_v40  ;;  %334 = vmatpush.msra.mxu2 %v243_v41  ;;  %v179_v63 = vld [vmem:[#allocation8 + $0x178] sm:$0xff]  ;;  %v176_v3 = vld [vmem:[#allocation8 + $0x160] sm:$0xff]  ;;  %v217_v5 = vld [vmem:[#allocation8 + $0x2a8] sm:$0xff] }
  0x33   :  { %295 = vmatpush.msra.mxu0 %v144_v39  ;;  %314 = vmatpush.msra.mxu1 %v195_v46  ;;  %v183_v0 = vld [vmem:[#allocation8 + $0x198] sm:$0xff]  ;;  %v180_v6 = vld [vmem:[#allocation8 + $0x180] sm:$0xff]  ;;  %v274_v7 = vld [vmem:[#allocation8 + $0x470] sm:$0xff] }
  0x34   :  { %354 = vmatpush.msra.mxu3 %v148_v44  ;;  %335 = vmatpush.msra.mxu2 %v240_v45  ;;  %v227_v4 = vld [vmem:[#allocation8 + $0x2f8] sm:$0xff]  ;;  %v173_v8 = vld [vmem:[#allocation8 + $0x148] sm:$0xff]  ;;  %v214_v9 = vld [vmem:[#allocation8 + $0x290] sm:$0xff] }
  0x35   :  { %296 = vmatpush.msra.mxu0 %v141_v43  ;;  %315 = vmatpush.msra.mxu1 %v192_v50  ;;  %v224_v10 = vld [vmem:[#allocation8 + $0x2e0] sm:$0xff]  ;;  %v271_v11 = vld [vmem:[#allocation8 + $0x458] sm:$0xff]  ;;  %v170_v12 = vld [vmem:[#allocation8 + $0x130] sm:$0xff] }
  0x36   :  { %355 = vmatpush.msra.mxu3 %v145_v48  ;;  %336 = vmatpush.msra.mxu2 %v237_v49  ;;  %v211_v13 = vld [vmem:[#allocation8 + $0x278] sm:$0xff]  ;;  %v221_v14 = vld [vmem:[#allocation8 + $0x2c8] sm:$0xff]  ;;  %v268_v16 = vld [vmem:[#allocation8 + $0x440] sm:$0xff] }
  0x37   :  { %297 = vmatpush.msra.mxu0 %v138_v47  ;;  %316 = vmatpush.msra.mxu1 %v189_v54  ;;  %v1186_v15 = vld [vmem:[#allocation5 + $0x8] sm:$0xff]  ;;  %v208_v17 = vld [vmem:[#allocation8 + $0x260] sm:$0xff]  ;;  %v167_v18 = vld [vmem:[#allocation8 + $0x118] sm:$0xff] }
  0x38   :  { %356 = vmatpush.msra.mxu3 %v142_v52  ;;  %337 = vmatpush.msra.mxu2 %v234_v53  ;;  %v218_v19 = vld [vmem:[#allocation8 + $0x2b0] sm:$0xff]  ;;  %v1188_v20 = vld [vmem:[#allocation2] sm:$0xff]  ;;  %v205_v21 = vld [vmem:[#allocation8 + $0x248] sm:$0xff] }
  0x39   :  { %298 = vmatpush.msra.mxu0 %v135_v51  ;;  %317 = vmatpush.msra.mxu1 %v186_v59  ;;  %v265_v22 = vld [vmem:[#allocation8 + $0x428] sm:$0xff]  ;;  %v164_v23 = vld [vmem:[#allocation8 + $0x100] sm:$0xff]  ;;  %v215_v24 = vld [vmem:[#allocation8 + $0x298] sm:$0xff] }
  0x3a   :  { %357 = vmatpush.msra.mxu3 %v139_v56  ;;  %338 = vmatpush.msra.mxu2 %v231_v58  ;;  %v202_v25 = vld [vmem:[#allocation8 + $0x230] sm:$0xff]  ;;  %v1192_v26 = vld [vmem:[#allocation5] sm:$0xff]  ;;  %v161_v28 = vld [vmem:[#allocation8 + $0xe8] sm:$0xff] }
  0x3b   :  { %299 = vmatpush.msra.mxu0 %v132_v55  ;;  %318 = vmatpush.msra.mxu1 %v183_v0  ;;  %v262_v27 = vld [vmem:[#allocation8 + $0x410] sm:$0xff]  ;;  %v199_v29 = vld [vmem:[#allocation8 + $0x218] sm:$0xff]  ;;  %v212_v30 = vld [vmem:[#allocation8 + $0x280] sm:$0xff] }
  0x3c   :  { %358 = vmatpush.msra.mxu3 %v136_v60  ;;  %339 = vmatpush.msra.mxu2 %v228_v62  ;;  %v259_v31 = vld [vmem:[#allocation8 + $0x3f8] sm:$0xff]  ;;  %v158_v32 = vld [vmem:[#allocation8 + $0xd0] sm:$0xff]  ;;  %v196_v33 = vld [vmem:[#allocation8 + $0x200] sm:$0xff] }
  0x3d   :  { %364 = vmatpush.msrb.mxu0 %v226_v57  ;;  %319 = vmatpush.msra.mxu1 %v180_v6  ;;  %v209_v34 = vld [vmem:[#allocation8 + $0x268] sm:$0xff]  ;;  %v256_v35 = vld [vmem:[#allocation8 + $0x3e0] sm:$0xff]  ;;  %v155_v36 = vld [vmem:[#allocation8 + $0xb8] sm:$0xff] }
  0x3e   :  { %404 = vmatpush.msrb.mxu2 %v179_v63  ;;  %359 = vmatpush.msra.mxu3 %v133_v2  ;;  %v193_v37 = vld [vmem:[#allocation8 + $0x1e8] sm:$0xff]  ;;  %v206_v38 = vld [vmem:[#allocation8 + $0x250] sm:$0xff]  ;;  %v152_v40 = vld [vmem:[#allocation8 + $0xa0] sm:$0xff] }
  0x3f   :  { %365 = vmatpush.msrb.mxu0 %v223_v61  ;;  %384 = vmatpush.msrb.mxu1 %v274_v7  ;;  %v253_v39 = vld [vmem:[#allocation8 + $0x3c8] sm:$0xff]  ;;  %v190_v41 = vld [vmem:[#allocation8 + $0x1d0] sm:$0xff]  ;;  %v203_v42 = vld [vmem:[#allocation8 + $0x238] sm:$0xff] }
  0x40   :  { %405 = vmatpush.msrb.mxu2 %v176_v3  ;;  %424 = vmatpush.msrb.mxu3 %v227_v4  ;;  %v250_v43 = vld [vmem:[#allocation8 + $0x3b0] sm:$0xff]  ;;  %v149_v44 = vld [vmem:[#allocation8 + $0x88] sm:$0xff]  ;;  %v187_v45 = vld [vmem:[#allocation8 + $0x1b8] sm:$0xff] }
  0x41   :  { %366 = vmatpush.msrb.mxu0 %v220_v1  ;;  %385 = vmatpush.msrb.mxu1 %v271_v11  ;;  %v200_v46 = vld [vmem:[#allocation8 + $0x220] sm:$0xff]  ;;  %v247_v47 = vld [vmem:[#allocation8 + $0x398] sm:$0xff]  ;;  %v146_v48 = vld [vmem:[#allocation8 + $0x70] sm:$0xff] }
  0x42   :  { %406 = vmatpush.msrb.mxu2 %v173_v8  ;;  %425 = vmatpush.msrb.mxu3 %v224_v10  ;;  %v184_v49 = vld [vmem:[#allocation8 + $0x1a0] sm:$0xff]  ;;  %v197_v50 = vld [vmem:[#allocation8 + $0x208] sm:$0xff]  ;;  %v143_v52 = vld [vmem:[#allocation8 + $0x58] sm:$0xff] }
  0x43   :  { %367 = vmatpush.msrb.mxu0 %v217_v5  ;;  %340 = vmatmul.f32.vlgmr.msra.gmra.mxu2 %v1186_v15  ;;  %v244_v51 = vld [vmem:[#allocation8 + $0x380] sm:$0xff]  ;;  %v181_v53 = vld [vmem:[#allocation8 + $0x188] sm:$0xff]  ;;  %v194_v54 = vld [vmem:[#allocation8 + $0x1f0] sm:$0xff] }
  0x44   :  { %407 = vmatpush.msrb.mxu2 %v170_v12  ;;  %426 = vmatpush.msrb.mxu3 %v221_v14  ;;  %v275_v55 = vld [vmem:[#allocation8 + $0x478] sm:$0xff]  ;;  %v241_v56 = vld [vmem:[#allocation8 + $0x368] sm:$0xff]  ;;  %v140_v57 = vld [vmem:[#allocation8 + $0x40] sm:$0xff] }
  0x45   :  { %368 = vmatpush.msrb.mxu0 %v214_v9  ;;  %386 = vmatpush.msrb.mxu1 %v268_v16  ;;  %v272_v58 = vld [vmem:[#allocation8 + $0x460] sm:$0xff]  ;;  %v191_v59 = vld [vmem:[#allocation8 + $0x1d8] sm:$0xff]  ;;  %v238_v60 = vld [vmem:[#allocation8 + $0x350] sm:$0xff] }
  0x46   :  { %408 = vmatpush.msrb.mxu2 %v167_v18  ;;  %427 = vmatpush.msrb.mxu3 %v218_v19  ;;  %v137_v61 = vld [vmem:[#allocation8 + $0x28] sm:$0xff]  ;;  %v188_v63 = vld [vmem:[#allocation8 + $0x1c0] sm:$0xff]  ;;  %v235_v0 = vld [vmem:[#allocation8 + $0x338] sm:$0xff] }
  0x47   :  { %369 = vmatpush.msrb.mxu0 %v211_v13  ;;  %387 = vmatpush.msrb.mxu1 %v265_v22  ;;  %v269_v62 = vld [vmem:[#allocation8 + $0x448] sm:$0xff]  ;;  %v134_v1 = vld [vmem:[#allocation8 + $0x10] sm:$0xff]  ;;  %v232_v4 = vld [vmem:[#allocation8 + $0x320] sm:$0xff] }
  0x48   :  { %300 = vmatmul.f32.vlgmr.msra.gmra.mxu0 %v1188_v20  ;;  %409 = vmatpush.msrb.mxu2 %v164_v23  ;;  %v266_v2 = vld [vmem:[#allocation8 + $0x430] sm:$0xff]  ;;  %v185_v3 = vld [vmem:[#allocation8 + $0x1a8] sm:$0xff]  ;;  %v263_v5 = vld [vmem:[#allocation8 + $0x418] sm:$0xff] }
  0x49   :  { %370 = vmatpush.msrb.mxu0 %v208_v17  ;;  %428 = vmatpush.msrb.mxu3 %v215_v24  ;;  %v182_v6 = vld [vmem:[#allocation8 + $0x190] sm:$0xff]  ;;  %v260_v7 = vld [vmem:[#allocation8 + $0x400] sm:$0xff]  ;;  %v229_v8 = vld [vmem:[#allocation8 + $0x308] sm:$0xff] }
  0x4a   :  { %320 = vmatmul.f32.vlgmr.msra.gmra.mxu1 %v1192_v26  ;;  %410 = vmatpush.msrb.mxu2 %v161_v28  ;;  %v607_v9 = vld [vmem:[#allocation10 + $0x468] sm:$0xff]  ;;  %v604_v12 = vld [vmem:[#allocation10 + $0x450] sm:$0xff]  ;;  %v601_v17 = vld [vmem:[#allocation10 + $0x438] sm:$0xff] }
  0x4b   :  { %371 = vmatpush.msrb.mxu0 %v205_v21  ;;  %388 = vmatpush.msrb.mxu1 %v262_v27  ;;  %v257_v10 = vld [vmem:[#allocation8 + $0x3e8] sm:$0xff]  ;;  %v254_v14 = vld [vmem:[#allocation8 + $0x3d0] sm:$0xff]  ;;  %v251_v19 = vld [vmem:[#allocation8 + $0x3b8] sm:$0xff] }
  0x4c   :  { %429 = vmatpush.msrb.mxu3 %v212_v30  ;;  %411 = vmatpush.msrb.mxu2 %v158_v32  ;;  %v511_v11 = vld [vmem:[#allocation10 + $0x168] sm:$0xff]  ;;  %v508_v16 = vld [vmem:[#allocation10 + $0x150] sm:$0xff]  ;;  %v598_v21 = vld [vmem:[#allocation10 + $0x420] sm:$0xff] }
  0x4d   :  { %372 = vmatpush.msrb.mxu0 %v202_v25  ;;  %389 = vmatpush.msrb.mxu1 %v259_v31  ;;  %v559_v13 = vld [vmem:[#allocation10 + $0x2e8] sm:$0xff]  ;;  %v556_v18 = vld [vmem:[#allocation10 + $0x2d0] sm:$0xff]  ;;  %v553_v22 = vld [vmem:[#allocation10 + $0x2b8] sm:$0xff] }
  0x4e   :  { %430 = vmatpush.msrb.mxu3 %v209_v34  ;;  %412 = vmatpush.msrb.mxu2 %v155_v36  ;;  %v248_v23 = vld [vmem:[#allocation8 + $0x3a0] sm:$0xff]  ;;  %v595_v25 = vld [vmem:[#allocation10 + $0x408] sm:$0xff]  ;;  %v242_v31 = vld [vmem:[#allocation8 + $0x370] sm:$0xff] }
  0x4f   :  { %373 = vmatpush.msrb.mxu0 %v199_v29  ;;  %390 = vmatpush.msrb.mxu1 %v256_v35  ;;  %v502_v24 = vld [vmem:[#allocation10 + $0x120] sm:$0xff]  ;;  %v245_v27 = vld [vmem:[#allocation8 + $0x388] sm:$0xff]  ;;  %v592_v29 = vld [vmem:[#allocation10 + $0x3f0] sm:$0xff] }
  0x50   :  { %431 = vmatpush.msrb.mxu3 %v206_v38  ;;  %413 = vmatpush.msrb.mxu2 %v152_v40  ;;  %v499_v28 = vld [vmem:[#allocation10 + $0x108] sm:$0xff]  ;;  %v496_v32 = vld [vmem:[#allocation10 + $0xf0] sm:$0xff]  ;;  %v239_v35 = vld [vmem:[#allocation8 + $0x358] sm:$0xff] }
  0x51   :  { %374 = vmatpush.msrb.mxu0 %v196_v33  ;;  %391 = vmatpush.msrb.mxu1 %v253_v39  ;;  %v547_v30 = vld [vmem:[#allocation10 + $0x288] sm:$0xff]  ;;  %v589_v33 = vld [vmem:[#allocation10 + $0x3d8] sm:$0xff]  ;;  %v544_v34 = vld [vmem:[#allocation10 + $0x270] sm:$0xff] }
  0x52   :  { %432 = vmatpush.msrb.mxu3 %v203_v42  ;;  %414 = vmatpush.msrb.mxu2 %v149_v44  ;;  %v493_v36 = vld [vmem:[#allocation10 + $0xd8] sm:$0xff]  ;;  %v236_v39 = vld [vmem:[#allocation8 + $0x340] sm:$0xff]  ;;  %v487_v44 = vld [vmem:[#allocation10 + $0xa8] sm:$0xff] }
  0x53   :  { %375 = vmatpush.msrb.mxu0 %v193_v37  ;;  %392 = vmatpush.msrb.mxu1 %v250_v43  ;;  %v586_v37 = vld [vmem:[#allocation10 + $0x3c0] sm:$0xff]  ;;  %v541_v38 = vld [vmem:[#allocation10 + $0x258] sm:$0xff]  ;;  %v233_v43 = vld [vmem:[#allocation8 + $0x328] sm:$0xff] }
  0x54   :  { %433 = vmatpush.msrb.mxu3 %v200_v46  ;;  %415 = vmatpush.msrb.mxu2 %v146_v48  ;;  %v490_v40 = vld [vmem:[#allocation10 + $0xc0] sm:$0xff]  ;;  %v535_v46 = vld [vmem:[#allocation10 + $0x228] sm:$0xff]  ;;  %v484_v48 = vld [vmem:[#allocation10 + $0x90] sm:$0xff] }
  0x55   :  { %376 = vmatpush.msrb.mxu0 %v190_v41  ;;  %393 = vmatpush.msrb.mxu1 %v247_v47  ;;  %v583_v41 = vld [vmem:[#allocation10 + $0x3a8] sm:$0xff]  ;;  %v538_v42 = vld [vmem:[#allocation10 + $0x240] sm:$0xff]  ;;  %v230_v47 = vld [vmem:[#allocation8 + $0x310] sm:$0xff] }
  0x56   :  { %434 = vmatpush.msrb.mxu3 %v197_v50  ;;  %416 = vmatpush.msrb.mxu2 %v143_v52  ;;  %v512_v50 = vld [vmem:[#allocation10 + $0x170] sm:$0xff] }
  0x57   :  { %377 = vmatpush.msrb.mxu0 %v187_v45  ;;  %394 = vmatpush.msrb.mxu1 %v244_v51  ;;  %v580_v45 = vld [vmem:[#allocation10 + $0x390] sm:$0xff]  ;;  %v481_v51 = vld [vmem:[#allocation10 + $0x78] sm:$0xff] }
  0x58   :  { %435 = vmatpush.msrb.mxu3 %v194_v54  ;;  %417 = vmatpush.msrb.mxu2 %v140_v57  ;;  %v532_v52 = vld [vmem:[#allocation10 + $0x210] sm:$0xff]  ;;  %v509_v54 = vld [vmem:[#allocation10 + $0x158] sm:$0xff]  ;;  %v571_v57 = vld [vmem:[#allocation10 + $0x348] sm:$0xff] }
  0x59   :  { %378 = vmatpush.msrb.mxu0 %v184_v49  ;;  %360 = vmatmul.f32.vlgmr.msra.gmra.mxu3 %v1188_v20  ;;  %v577_v49 = vld [vmem:[#allocation10 + $0x378] sm:$0xff] }
  0x5a   :  { %395 = vmatpush.msrb.mxu1 %v241_v56  ;;  %436 = vmatpush.msrb.mxu3 %v191_v59  ;;  %v529_v56 = vld [vmem:[#allocation10 + $0x1f8] sm:$0xff]  ;;  %v475_v59 = vld [vmem:[#allocation10 + $0x48] sm:$0xff] }
  0x5b   :  { %379 = vmatpush.msrb.mxu0 %v181_v53  ;;  %418 = vmatpush.msrb.mxu2 %v137_v61  ;;  %v574_v53 = vld [vmem:[#allocation10 + $0x360] sm:$0xff]  ;;  %v568_v61 = vld [vmem:[#allocation10 + $0x330] sm:$0xff] }
  0x5c   :  { %396 = vmatpush.msrb.mxu1 %v238_v60  ;;  %437 = vmatpush.msrb.mxu3 %v188_v63  ;;  %v526_v60 = vld [vmem:[#allocation10 + $0x1e0] sm:$0xff]  ;;  %v472_v63 = vld [vmem:[#allocation10 + $0x30] sm:$0xff] }
  0x5d   :  { %444 = vmatpush.msra.mxu0 %v275_v55  ;;  %419 = vmatpush.msrb.mxu2 %v134_v1  ;;  %v478_v55 = vld [vmem:[#allocation10 + $0x60] sm:$0xff] }
  0x5e   :  { %397 = vmatpush.msrb.mxu1 %v235_v0  ;;  %438 = vmatpush.msrb.mxu3 %v185_v3  ;;  %v497_v0 = vld [vmem:[#allocation10 + $0xf8] sm:$0xff]  ;;  %v494_v1 = vld [vmem:[#allocation10 + $0xe0] sm:$0xff]  ;;  %v488_v3 = vld [vmem:[#allocation10 + $0xb0] sm:$0xff] }
  0x5f   :  { %445 = vmatpush.msra.mxu0 %v272_v58  ;;  %420 = vmatmul.f32.vlgmr.msrb.gmra.mxu2 %v1188_v20  ;;  %v505_v20 = vld [vmem:[#allocation10 + $0x138] sm:$0xff]  ;;  %v506_v58 = vld [vmem:[#allocation10 + $0x140] sm:$0xff] }
  0x60   :  { %398 = vmatpush.msrb.mxu1 %v232_v4  ;;  %439 = vmatpush.msrb.mxu3 %v182_v6  ;;  %v485_v4 = vld [vmem:[#allocation10 + $0x98] sm:$0xff]  ;;  %v523_v6 = vld [vmem:[#allocation10 + $0x1c8] sm:$0xff] }
  0x61   :  { %446 = vmatpush.msra.mxu0 %v269_v62  ;;  %440 = vmatmul.f32.vlgmr.msrb.gmra.mxu3 %v1192_v26  ;;  %v503_v62 = vld [vmem:[#allocation10 + $0x128] sm:$0xff] }
  0x62   :  { %380 = vmatmul.f32.vlgmr.msrb.gmra.mxu0 %v1192_v26  ;;  %399 = vmatpush.msrb.mxu1 %v229_v8  ;;  %v550_v26 = vld [vmem:[#allocation10 + $0x2a0] sm:$0xff] }
  0x63   :  { %447 = vmatpush.msra.mxu0 %v266_v2  ;;  %400 = vmatmul.f32.vlgmr.msrb.gmra.mxu1 %v1186_v15  ;;  %v491_v2 = vld [vmem:[#allocation10 + $0xc8] sm:$0xff]  ;;  %v482_v8 = vld [vmem:[#allocation10 + $0x80] sm:$0xff] }
  0x64   :  { %658 = vmatpush.msra.mxu3 %v607_v9  ;;  %618 = vmatpush.msra.mxu1 %v511_v11  ;;  %v466_v9 = vld [vmem:[#allocation10] sm:$0xff] }
  0x65   :  { %448 = vmatpush.msra.mxu0 %v263_v5  ;;  %638 = vmatpush.msra.mxu2 %v559_v13  ;;  %v469_v5 = vld [vmem:[#allocation10 + $0x18] sm:$0xff]  ;;  %v562_v11 = vld [vmem:[#allocation10 + $0x300] sm:$0xff]  ;;  %v560_v13 = vld [vmem:[#allocation10 + $0x2f0] sm:$0xff] }
  0x66   :  { %659 = vmatpush.msra.mxu3 %v604_v12  ;;  %619 = vmatpush.msra.mxu1 %v508_v16  ;;  %v479_v12 = vld [vmem:[#allocation10 + $0x68] sm:$0xff]  ;;  %v517_v16 = vld [vmem:[#allocation10 + $0x198] sm:$0xff] }
  0x67   :  { %449 = vmatpush.msra.mxu0 %v260_v7  ;;  %639 = vmatpush.msra.mxu2 %v556_v18  ;;  %v565_v7 = vld [vmem:[#allocation10 + $0x318] sm:$0xff] }
  0x68   :  { %660 = vmatpush.msra.mxu3 %v601_v17  ;;  %620 = vmatpush.msra.mxu1 %v505_v20  ;;  %v476_v17 = vld [vmem:[#allocation10 + $0x50] sm:$0xff]  ;;  %v557_v18 = vld [vmem:[#allocation10 + $0x2d8] sm:$0xff]  ;;  %v514_v20 = vld [vmem:[#allocation10 + $0x180] sm:$0xff] }
  0x69   :  { %450 = vmatpush.msra.mxu0 %v257_v10  ;;  %640 = vmatpush.msra.mxu2 %v553_v22  ;;  %v520_v10 = vld [vmem:[#allocation10 + $0x1b0] sm:$0xff]  ;;  %v554_v22 = vld [vmem:[#allocation10 + $0x2c0] sm:$0xff] }
  0x6a   :  { %661 = vmatpush.msra.mxu3 %v598_v21  ;;  %621 = vmatpush.msra.mxu1 %v502_v24  ;;  %v473_v21 = vld [vmem:[#allocation10 + $0x38] sm:$0xff]  ;;  %v507_v24 = vld [vmem:[#allocation10 + $0x148] sm:$0xff] }
  0x6b   :  { %451 = vmatpush.msra.mxu0 %v254_v14  ;;  %641 = vmatpush.msra.mxu2 %v550_v26  ;;  %v513_v14 = vld [vmem:[#allocation10 + $0x178] sm:$0xff]  ;;  %v551_v26 = vld [vmem:[#allocation10 + $0x2a8] sm:$0xff] }
  0x6c   :  { %662 = vmatpush.msra.mxu3 %v595_v25  ;;  %622 = vmatpush.msra.mxu1 %v499_v28  ;;  %v470_v25 = vld [vmem:[#allocation10 + $0x20] sm:$0xff]  ;;  %v504_v28 = vld [vmem:[#allocation10 + $0x130] sm:$0xff] }
  0x6d   :  { %452 = vmatpush.msra.mxu0 %v251_v19  ;;  %642 = vmatpush.msra.mxu2 %v547_v30  ;;  %v510_v19 = vld [vmem:[#allocation10 + $0x160] sm:$0xff]  ;;  %v548_v30 = vld [vmem:[#allocation10 + $0x290] sm:$0xff] }
  0x6e   :  { %663 = vmatpush.msra.mxu3 %v592_v29  ;;  %623 = vmatpush.msra.mxu1 %v496_v32  ;;  %v467_v29 = vld [vmem:[#allocation10 + $0x8] sm:$0xff]  ;;  %v501_v32 = vld [vmem:[#allocation10 + $0x118] sm:$0xff] }
  0x6f   :  { %453 = vmatpush.msra.mxu0 %v248_v23  ;;  %643 = vmatpush.msra.mxu2 %v544_v34  ;;  %v608_v23 = vld [vmem:[#allocation10 + $0x470] sm:$0xff]  ;;  %v545_v34 = vld [vmem:[#allocation10 + $0x278] sm:$0xff] }
  0x70   :  { %664 = vmatpush.msra.mxu3 %v589_v33  ;;  %624 = vmatpush.msra.mxu1 %v493_v36  ;;  %v561_v33 = vld [vmem:[#allocation10 + $0x2f8] sm:$0xff]  ;;  %v498_v36 = vld [vmem:[#allocation10 + $0x100] sm:$0xff] }
  0x71   :  { %454 = vmatpush.msra.mxu0 %v245_v27  ;;  %644 = vmatpush.msra.mxu2 %v541_v38  ;;  %v605_v27 = vld [vmem:[#allocation10 + $0x458] sm:$0xff]  ;;  %v542_v38 = vld [vmem:[#allocation10 + $0x260] sm:$0xff] }
  0x72   :  { %665 = vmatpush.msra.mxu3 %v586_v37  ;;  %625 = vmatpush.msra.mxu1 %v490_v40  ;;  %v558_v37 = vld [vmem:[#allocation10 + $0x2e0] sm:$0xff]  ;;  %v495_v40 = vld [vmem:[#allocation10 + $0xe8] sm:$0xff] }
  0x73   :  { %455 = vmatpush.msra.mxu0 %v242_v31  ;;  %645 = vmatpush.msra.mxu2 %v538_v42  ;;  %v602_v31 = vld [vmem:[#allocation10 + $0x440] sm:$0xff]  ;;  %v539_v42 = vld [vmem:[#allocation10 + $0x248] sm:$0xff] }
  0x74   :  { %666 = vmatpush.msra.mxu3 %v583_v41  ;;  %626 = vmatpush.msra.mxu1 %v487_v44  ;;  %v555_v41 = vld [vmem:[#allocation10 + $0x2c8] sm:$0xff]  ;;  %v492_v44 = vld [vmem:[#allocation10 + $0xd0] sm:$0xff] }
  0x75   :  { %456 = vmatpush.msra.mxu0 %v239_v35  ;;  %646 = vmatpush.msra.mxu2 %v535_v46  ;;  %v599_v35 = vld [vmem:[#allocation10 + $0x428] sm:$0xff]  ;;  %v536_v46 = vld [vmem:[#allocation10 + $0x230] sm:$0xff] }
  0x76   :  { %667 = vmatpush.msra.mxu3 %v580_v45  ;;  %627 = vmatpush.msra.mxu1 %v484_v48  ;;  %v552_v45 = vld [vmem:[#allocation10 + $0x2b0] sm:$0xff]  ;;  %v489_v48 = vld [vmem:[#allocation10 + $0xb8] sm:$0xff] }
  0x77   :  { %457 = vmatpush.msra.mxu0 %v236_v39  ;;  %647 = vmatpush.msra.mxu2 %v532_v52  ;;  %v596_v39 = vld [vmem:[#allocation10 + $0x410] sm:$0xff]  ;;  %v486_v52 = vld [vmem:[#allocation10 + $0xa0] sm:$0xff] }
  0x78   :  { %668 = vmatpush.msra.mxu3 %v577_v49  ;;  %628 = vmatpush.msra.mxu1 %v481_v51  ;;  %v549_v49 = vld [vmem:[#allocation10 + $0x298] sm:$0xff]  ;;  %v587_v51 = vld [vmem:[#allocation10 + $0x3c8] sm:$0xff] }
  0x79   :  { %458 = vmatpush.msra.mxu0 %v233_v43  ;;  %648 = vmatpush.msra.mxu2 %v529_v56  ;;  %v593_v43 = vld [vmem:[#allocation10 + $0x3f8] sm:$0xff]  ;;  %v584_v56 = vld [vmem:[#allocation10 + $0x3b0] sm:$0xff] }
  0x7a   :  { %669 = vmatpush.msra.mxu3 %v574_v53  ;;  %629 = vmatpush.msra.mxu1 %v478_v55  ;;  %v1204_v53 = vld [vmem:[%s1232_s4] sm:$0x7]  ;;  %v530_v55 = vld [vmem:[#allocation10 + $0x200] sm:$0xff]  ;;  %s1115_s4 = smov [#allocation14]  }
  0x7b   :  { %459 = vmatpush.msra.mxu0 %v230_v47  ;;  %649 = vmatpush.msra.mxu2 %v526_v60  ;;  %v590_v47 = vld [vmem:[#allocation10 + $0x3e0] sm:$0xff]  ;;  %s829_s16 = sshll.u32 %s1115_s4, 4  ;;  %s830_s16 = int_to_ptr.vmem [resolvable:$true] %s829_s16 }
  0x7c   :  { %460 = vmatmul.f32.vlgmr.msra.gmra.mxu0 %v1186_v15  ;;  %670 = vmatpush.msra.mxu3 %v571_v57  ;;  %v500_v15 = vld [vmem:[#allocation10 + $0x110] sm:$0xff]  ;;  %v483_v57 = vld [vmem:[#allocation10 + $0x88] sm:$0xff] }
  0x7d   :  { %678 = vmatpush.msrb.mxu0 %v512_v50  ;;  %630 = vmatpush.msra.mxu1 %v475_v59  ;;  %v533_v50 = vld [vmem:[#allocation10 + $0x218] sm:$0xff]  ;;  %v543_v59 = vld [vmem:[#allocation10 + $0x268] sm:$0xff] }
  0x7e   :  { %671 = vmatpush.msra.mxu3 %v568_v61  ;;  %650 = vmatpush.msra.mxu2 %v523_v6  ;;  %v527_v61 = vld [vmem:[#allocation10 + $0x1e8] sm:$0xff] }
  0x7f   :  { %679 = vmatpush.msrb.mxu0 %v509_v54  ;;  %631 = vmatpush.msra.mxu1 %v472_v63  ;;  %v546_v54 = vld [vmem:[#allocation10 + $0x280] sm:$0xff]  ;;  %v480_v63 = vld [vmem:[#allocation10 + $0x70] sm:$0xff] }
  0x80   :  { %672 = vmatpush.msra.mxu3 %v565_v7  ;;  %651 = vmatpush.msra.mxu2 %v520_v10  ;;  %v521_v7 = vld [vmem:[#allocation10 + $0x1b8] sm:$0xff] }
  0x81   :  { %680 = vmatpush.msrb.mxu0 %v506_v58  ;;  %632 = vmatpush.msra.mxu1 %v469_v5  ;;  %v278_v58 = vperm.slane %v1204_v53, 0  ;;  %v537_v5 = vld [vmem:[#allocation10 + $0x238] sm:$0xff] }
  0x82   :  { %673 = vmatpush.msra.mxu3 %v562_v11  ;;  %652 = vmatpush.msra.mxu2 %v517_v16  ;;  %v518_v16 = vld [vmem:[#allocation10 + $0x1a0] sm:$0xff] }
  0x83   :  { %681 = vmatpush.msrb.mxu0 %v503_v62  ;;  %633 = vmatpush.msra.mxu1 %v466_v9  ;;  %v581_v62 = vld [vmem:[#allocation10 + $0x398] sm:$0xff]  ;;  %v474_v9 = vld [vmem:[#allocation10 + $0x40] sm:$0xff] }
  0x84   :  { %738 = vmatpush.msrb.mxu3 %v513_v14  ;;  %653 = vmatpush.msra.mxu2 %v514_v20  ;;  %v515_v20 = vld [vmem:[#allocation10 + $0x188] sm:$0xff] }
  0x85   :  { %682 = vmatpush.msrb.mxu0 %v500_v15  ;;  %698 = vmatpush.msrb.mxu1 %v560_v13  ;;  %v1210_v13 = vld [vmem:[#allocation7] sm:$0xff] }
  0x86   :  { %739 = vmatpush.msrb.mxu3 %v510_v19  ;;  %718 = vmatpush.msrb.mxu2 %v608_v23  ;;  %v531_v19 = vld [vmem:[#allocation10 + $0x208] sm:$0xff]  ;;  %v528_v23 = vld [vmem:[#allocation10 + $0x1f0] sm:$0xff] }
  0x87   :  { %683 = vmatpush.msrb.mxu0 %v497_v0  ;;  %699 = vmatpush.msrb.mxu1 %v557_v18  ;;  %v540_v0 = vld [vmem:[#allocation10 + $0x250] sm:$0xff]  ;;  %v471_v18 = vld [vmem:[#allocation10 + $0x28] sm:$0xff] }
  0x88   :  { %740 = vmatpush.msrb.mxu3 %v507_v24  ;;  %719 = vmatpush.msrb.mxu2 %v605_v27  ;;  %v279_v24 = vperm.slane %v1204_v53, 1  ;;  %v563_v27 = vld [vmem:[#allocation10 + $0x308] sm:$0xff] }
  0x89   :  { %684 = vmatpush.msrb.mxu0 %v494_v1  ;;  %700 = vmatpush.msrb.mxu1 %v554_v22  ;;  %v1207_v1 = vld [vmem:[#allocation7 + $0x8] sm:$0xff]  ;;  %v468_v22 = vld [vmem:[#allocation10 + $0x10] sm:$0xff] }
  0x8a   :  { %741 = vmatpush.msrb.mxu3 %v504_v28  ;;  %720 = vmatpush.msrb.mxu2 %v602_v31  ;;  %v522_v28 = vld [vmem:[#allocation10 + $0x1c0] sm:$0xff]  ;;  %v519_v31 = vld [vmem:[#allocation10 + $0x1a8] sm:$0xff] }
  0x8b   :  { %685 = vmatpush.msrb.mxu0 %v491_v2  ;;  %701 = vmatpush.msrb.mxu1 %v551_v26  ;;  %v524_v2 = vld [vmem:[#allocation10 + $0x1d0] sm:$0xff]  ;;  %v525_v26 = vld [vmem:[#allocation10 + $0x1d8] sm:$0xff] }
  0x8c   :  { %742 = vmatpush.msrb.mxu3 %v501_v32  ;;  %721 = vmatpush.msrb.mxu2 %v599_v35 }
  0x8d   :  { %686 = vmatpush.msrb.mxu0 %v488_v3  ;;  %702 = vmatpush.msrb.mxu1 %v548_v30  ;;  %v578_v3 = vld [vmem:[#allocation10 + $0x380] sm:$0xff] }
  0x8e   :  { %743 = vmatpush.msrb.mxu3 %v498_v36  ;;  %722 = vmatpush.msrb.mxu2 %v596_v39 }
  0x8f   :  { %687 = vmatpush.msrb.mxu0 %v485_v4  ;;  %703 = vmatpush.msrb.mxu1 %v545_v34  ;;  %v477_v4 = vld [vmem:[#allocation10 + $0x58] sm:$0xff] }
  0x90   :  { %744 = vmatpush.msrb.mxu3 %v495_v40  ;;  %723 = vmatpush.msrb.mxu2 %v593_v43 }
  0x91   :  { %688 = vmatpush.msrb.mxu0 %v482_v8  ;;  %704 = vmatpush.msrb.mxu1 %v542_v38  ;;  %v575_v8 = vld [vmem:[#allocation10 + $0x368] sm:$0xff] }
  0x92   :  { %745 = vmatpush.msrb.mxu3 %v492_v44  ;;  %724 = vmatpush.msrb.mxu2 %v590_v47  ;;  %v609_v44 = vld [vmem:[#allocation10 + $0x478] sm:$0xff]  ;;  %v600_v47 = vld [vmem:[#allocation10 + $0x430] sm:$0xff] }
  0x93   :  { %689 = vmatpush.msrb.mxu0 %v479_v12  ;;  %705 = vmatpush.msrb.mxu1 %v539_v42  ;;  %v534_v12 = vld [vmem:[#allocation10 + $0x220] sm:$0xff] }
  0x94   :  { %746 = vmatpush.msrb.mxu3 %v489_v48  ;;  %725 = vmatpush.msrb.mxu2 %v587_v51  ;;  %v597_v48 = vld [vmem:[#allocation10 + $0x418] sm:$0xff]  ;;  %v588_v51 = vld [vmem:[#allocation10 + $0x3d0] sm:$0xff] }
  0x95   :  { %690 = vmatpush.msrb.mxu0 %v476_v17  ;;  %706 = vmatpush.msrb.mxu1 %v536_v46  ;;  %v572_v17 = vld [vmem:[#allocation10 + $0x350] sm:$0xff]  ;;  %v603_v46 = vld [vmem:[#allocation10 + $0x448] sm:$0xff] }
  0x96   :  { %747 = vmatpush.msrb.mxu3 %v486_v52  ;;  %726 = vmatpush.msrb.mxu2 %v584_v56  ;;  %v585_v52 = vld [vmem:[#allocation10 + $0x3b8] sm:$0xff] }
  0x97   :  { %691 = vmatpush.msrb.mxu0 %v473_v21  ;;  %707 = vmatpush.msrb.mxu1 %v533_v50  ;;  %v569_v21 = vld [vmem:[#allocation10 + $0x338] sm:$0xff]  ;;  %v591_v50 = vld [vmem:[#allocation10 + $0x3e8] sm:$0xff] }
  0x98   :  { %748 = vmatpush.msrb.mxu3 %v483_v57  ;;  %727 = vmatpush.msrb.mxu2 %v581_v62  ;;  %v573_v56 = vld [vmem:[#allocation10 + $0x358] sm:$0xff]  ;;  %v570_v57 = vld [vmem:[#allocation10 + $0x340] sm:$0xff] }
  0x99   :  { %692 = vmatpush.msrb.mxu0 %v470_v25  ;;  %708 = vmatpush.msrb.mxu1 %v530_v55  ;;  %v566_v25 = vld [vmem:[#allocation10 + $0x320] sm:$0xff]  ;;  %v576_v55 = vld [vmem:[#allocation10 + $0x370] sm:$0xff] }
  0x9a   :  { %749 = vmatpush.msrb.mxu3 %v480_v63  ;;  %728 = vmatpush.msrb.mxu2 %v578_v3 }
  0x9b   :  { %693 = vmatpush.msrb.mxu0 %v467_v29  ;;  %709 = vmatpush.msrb.mxu1 %v527_v61 }
  0x9c   :  { %674 = vmatmul.f32.vlgmr.msra.gmra.mxu3 %v1207_v1  ;;  %729 = vmatpush.msrb.mxu2 %v575_v8 }
  0x9d   :  { %758 = vmatpush.msra.mxu0 %v561_v33  ;;  %710 = vmatpush.msrb.mxu1 %v524_v2  ;;  %v516_v33 = vld [vmem:[#allocation10 + $0x190] sm:$0xff] }
  0x9e   :  { %750 = vmatpush.msrb.mxu3 %v477_v4  ;;  %654 = vmatmul.f32.vlgmr.msra.gmra.mxu2 %v1210_v13 }
  0x9f   :  { %759 = vmatpush.msra.mxu0 %v558_v37  ;;  %711 = vmatpush.msrb.mxu1 %v521_v7  ;;  %v280_v37 = vperm.slane %v1204_v53, 2  ;;  %v582_v53 = vld [vmem:[#allocation10 + $0x3a0] sm:$0xff] }
  0xa0   :  { %751 = vmatpush.msrb.mxu3 %v474_v9  ;;  %730 = vmatpush.msrb.mxu2 %v572_v17 }
  0xa1   :  { %760 = vmatpush.msra.mxu0 %v555_v41  ;;  %712 = vmatpush.msrb.mxu1 %v518_v16 }
  0xa2   :  { %752 = vmatpush.msrb.mxu3 %v471_v18  ;;  %731 = vmatpush.msrb.mxu2 %v569_v21 }
  0xa3   :  { %761 = vmatpush.msra.mxu0 %v552_v45  ;;  %713 = vmatpush.msrb.mxu1 %v515_v20  ;;  %v606_v45 = vld [vmem:[#allocation10 + $0x460] sm:$0xff] }
  0xa4   :  { %753 = vmatpush.msrb.mxu3 %v468_v22  ;;  %732 = vmatpush.msrb.mxu2 %v566_v25 }
  0xa5   :  { %762 = vmatpush.msra.mxu0 %v549_v49  ;;  %v594_v49 = vld [vmem:[#allocation10 + $0x400] sm:$0xff] }
  0xa6   :  { %733 = vmatpush.msrb.mxu2 %v563_v27 }
  0xa7   :  { %763 = vmatpush.msra.mxu0 %v546_v54  ;;  %734 = vmatmul.f32.vlgmr.msrb.gmra.mxu2 %v1207_v1  ;;  %v579_v54 = vld [vmem:[#allocation10 + $0x388] sm:$0xff] }
  0xa9   :  { %764 = vmatpush.msra.mxu0 %v543_v59  ;;  %v564_v59 = vld [vmem:[#allocation10 + $0x310] sm:$0xff] }
  0xab   :  { %765 = vmatpush.msra.mxu0 %v540_v0 }
  0xad   :  { %766 = vmatpush.msra.mxu0 %v537_v5 }
  0xaf   :  { %767 = vmatpush.msra.mxu0 %v534_v12 }
  0xb1   :  { %768 = vmatpush.msra.mxu0 %v531_v19 }
  0xb3   :  { %769 = vmatpush.msra.mxu0 %v528_v23 }
  0xb5   :  { %770 = vmatpush.msra.mxu0 %v525_v26 }
  0xb7   :  { %771 = vmatpush.msra.mxu0 %v522_v28 }
  0xb9   :  { %772 = vmatpush.msra.mxu0 %v519_v31 }
  0xbb   :  { %773 = vmatpush.msra.mxu0 %v516_v33 }
  0xc5   :  { %v301_v60 = vpop.f32.mrf.mxu0 }
  0xc6   :  { %v302_v15 = vadd.f32 %v301_v60, %v278_v58  ;;  %v341_v11 = vpop.f32.mrf.mxu2  ;;  %v567_v58 = vld [vmem:[#allocation10 + $0x328] sm:$0xff]  ;;  %v610_v60 = vld [vmem:[#allocation11] sm:$0x7] }
  0xc7   :  { %v321_v6 = vpop.f32.mrf.mxu1  ;;  %v612_v61 = vperm.slane %v610_v60, 0  ;;  %v613_v0 = vperm.slane %v610_v60, 1 }
  0xc8   :  { %v322_v10 = vadd.f32 %v321_v6, %v302_v15 }
  0xca   :  { %v342_v14 = vadd.f32 %v341_v11, %v322_v10  ;;  %v614_v11 = vperm.slane %v610_v60, 2 }
  0xcc   :  { %809 = vst [vmem:[#allocation14] sm:$0xff] %v342_v14 }
  0xdc   :  { %v361_v29 = vpop.f32.mrf.mxu3 }
  0xdd   :  { %v362_v30 = vadd.f32 %v361_v29, %v279_v24 }
  0xdf   :  { %v381_v32 = vpop.f32.mrf.mxu0 }
  0xe0   :  { %v382_v34 = vadd.f32 %v381_v32, %v362_v30  ;;  %v401_v35 = vpop.f32.mrf.mxu1 }
  0xe2   :  { %v402_v36 = vadd.f32 %v401_v35, %v382_v34  ;;  %v421_v38 = vpop.f32.mrf.mxu2 }
  0xe3   :  { %v422_v39 = vadd.f32 %v421_v38, %v280_v37 }
  0xe4   :  { %810 = vst [vmem:[#allocation14 + $0x8] sm:$0xff] %v402_v36  ;;  %v441_v40 = vpop.f32.mrf.mxu3 }
  0xe5   :  { %v442_v41 = vadd.f32 %v441_v40, %v422_v39  ;;  %834 = dma.vmem_to_hbm [thread:$0]  %s830_s16, 256, %s832_s19, [#allocation15]  }
  0xf9   :  { %v461_v42 = vpop.f32.mrf.mxu0 }
  0xfa   :  { %v462_v43 = vadd.f32 %v461_v42, %v442_v41 }
  0xfc   :  { %634 = vmatmul.f32.vlgmr.msra.gmra.mxu1 %v462_v43  ;;  %694 = vmatmul.f32.vlgmr.msrb.gmra.mxu0 %v462_v43 }
  0xfd   :  { %754 = vmatmul.f32.vlgmr.msrb.gmra.mxu3 %v462_v43  ;;  %778 = vmatpush.msra.mxu1 %v609_v44 }
  0xff   :  { %779 = vmatpush.msra.mxu1 %v606_v45 }
 0x101   :  { %780 = vmatpush.msra.mxu1 %v603_v46 }
 0x103   :  { %781 = vmatpush.msra.mxu1 %v600_v47 }
 0x104   :  { %714 = vmatmul.f32.vlgmr.msrb.gmra.mxu1 %v1210_v13  ;;  %774 = vmatmul.f32.vlgmr.msra.gmra.mxu0 %v1210_v13 }
 0x105   :  { %782 = vmatpush.msra.mxu1 %v597_v48 }
 0x107   :  { %783 = vmatpush.msra.mxu1 %v594_v49 }
 0x109   :  { %784 = vmatpush.msra.mxu1 %v591_v50 }
 0x10b   :  { %785 = vmatpush.msra.mxu1 %v588_v51 }
 0x10d   :  { %786 = vmatpush.msra.mxu1 %v585_v52 }
 0x10f   :  { %787 = vmatpush.msra.mxu1 %v582_v53 }
 0x111   :  { %788 = vmatpush.msra.mxu1 %v579_v54 }
 0x113   :  { %789 = vmatpush.msra.mxu1 %v576_v55 }
 0x115   :  { %790 = vmatpush.msra.mxu1 %v573_v56 }
 0x117   :  { %791 = vmatpush.msra.mxu1 %v570_v57 }
 0x119   :  { %792 = vmatpush.msra.mxu1 %v567_v58 }
 0x11b   :  { %793 = vmatpush.msra.mxu1 %v564_v59 }
 0x11c   :  { %794 = vmatmul.f32.vlgmr.msra.gmra.mxu1 %v1207_v1 }
 0x11f   :  { %v675_v3 = vpop.f32.mrf.mxu3 }
 0x121   :  { %v655_v62 = vpop.f32.mrf.mxu2 }
 0x12a   :  { %v735_v8 = vpop.f32.mrf.mxu2 }
 0x179   :  { %v635_v63 = vpop.f32.mrf.mxu1  ;;  %v695_v4 = vpop.f32.mrf.mxu0 }
 0x17a   :  { %v636_v15 = vadd.f32 %v635_v63, %v612_v61  ;;  %v696_v6 = vadd.f32 %v695_v4, %v613_v0 }
 0x17c   :  { %v656_v2 = vadd.f32 %v655_v62, %v636_v15 }
 0x17e   :  { %v676_v5 = vadd.f32 %v675_v3, %v656_v2 }
 0x180   :  { %811 = vst [vmem:[#allocation16] sm:$0xff] %v676_v5  ;;  %v755_v12 = vpop.f32.mrf.mxu3 }
 0x181   :  { %v715_v7 = vpop.f32.mrf.mxu1  ;;  %v756_v1 = vadd.f32 %v755_v12, %v614_v11  ;;  %v775_v13 = vpop.f32.mrf.mxu0 }
 0x182   :  { %v716_v9 = vadd.f32 %v715_v7, %v696_v6 }
 0x183   :  { %v776_v14 = vadd.f32 %v775_v13, %v756_v1 }
 0x184   :  { %v736_v10 = vadd.f32 %v735_v8, %v716_v9 }
 0x186   :  { %812 = vst [vmem:[#allocation16 + $0x8] sm:$0xff] %v736_v10 }
 0x187   :  { %845 = dma.vmem_to_hbm [thread:$0]  %s841_s21, 256, %s843_s23, [#allocation15]  }
 0x199   :  { %v795_v16 = vpop.f32.mrf.mxu1 }
 0x19a   :  { %v796_v17 = vadd.f32 %v795_v16, %v776_v14 }
 0x19c   :  { %798 = vmax.xlane.f32.xlu0 %v796_v17 }
 0x20f   :  { %v799_v18 = vpop.xlane.xlu0 %798 }
 0x210   :  { %v800_v19 = vsub.f32 %v796_v17, %v799_v18 }
 0x212   :  { %v801_v20 = vmul.f32 1.442695, %v800_v19 }
 0x214   :  { %875 = vpow2.f32 %v801_v20 }
 0x21a   :  { %v876_v21 = vpop.eup %875 }
 0x21b   :  { %803 = vadd.xlane.f32.xlu0 %v876_v21 }
 0x28e   :  { %v804_v22 = vpop.xlane.xlu0 %803 }
 0x28f   :  { %877 = vlog2.f32 %v804_v22 }
 0x295   :  { %v878_v23 = vpop.eup %877 }
 0x296   :  { %v806_v24 = vmul.f32 0.6931472, %v878_v23 }
 0x298   :  { %v807_v25 = vsub.f32 %v800_v19, %v806_v24 }
 0x29a   :  { %808 = vst [vmem:[#allocation13] sm:$0xff] %v807_v25 }
 0x29b   :  { %823 = dma.vmem_to_hbm [thread:$0]  %s819_s25, 128, %s821_s3, [#allocation4]  }
 0x29c   :  { %1103 = dma.done.wait [#allocation4], 128  }
 0x29d   :  { %1104 = vsyncadd [#allocation4], 4294967168 }
 0x29e   :  { %1105 = dma.done.wait [#allocation15], 512  }
 0x29f   :  { %1106 = vsyncadd [#allocation15], 4294966784 }
 0x2a0   :  { %858 = vsyncpa [#allocation3], 1 }
 0x2a1   :  { %859 = vsyncpa [#allocation6], 1 }
 0x2a2   :  { %860 = vsyncpa [#allocation9], 1 }
 0x2a3   :  { %861 = vsyncpa [#allocation12], 1 }
 0x2a4   :  { %862 = vsyncpa [#allocation4], 1 }
 0x2a5   :  { %863 = vsyncpa [#allocation15], 1 }

</bundles_post_ra>
